<compile_context>
chip_gen: v5e
topology: v5e:2x2
jax: 0.10.0
libtpu: 0.0.40
codegen_flags: <defaults>
</compile_context>

<pallas_src>
import jax
import jax.numpy as jnp
from jax import lax
from jax.experimental import pallas as pl
from jax.experimental.pallas import tpu as pltpu


def _round_up(n: int, m: int) -> int:
    return -(-n // m) * m


def _vmem_limit_bytes() -> int:
    """Generation-aware scoped-VMEM limit: ~3/4 of physical VMEM, capped at
    96 MiB.  v5e/v6e (128 MiB) -> 96 MiB, v7x (64 MiB/TC) -> 48 MiB; falls back
    to the conservative 48 MiB if the hardware query is unavailable."""
    phys = 64 * 1024 * 1024
    try:
        phys = int(pltpu.get_tpu_info().vmem_capacity_bytes)
    except Exception:  # query unavailable (old jax / non-TPU tracing)
        pass
    return min((phys * 3) // 4, 96 * 1024 * 1024)


def _pick_tile_m(m: int, b: int, in_c: int, out_c: int, w_bytes: int,
                 budget_bytes: int, *, max_tile: int = 2048) -> int:
    """Largest multiple-of-128 mode tile whose double-buffered working set
    (x/w/out tiles + live f32 accumulators) fits the VMEM budget, then capped
    so the parallel mode axis keeps >= 2 grid steps for v7x megacore."""
    per_lane_col = (
        2 * (2 * in_c * b * 4            # x tile, double-buffered, f32
             + 2 * in_c * out_c * w_bytes  # w tile, double-buffered
             + 2 * b * out_c * 4)          # out tile, double-buffered, f32
        + 2 * b * out_c * 4                # live f32 accumulators
    )
    tm = (budget_bytes // per_lane_col) // 128 * 128
    tm = max(128, min(tm, max_tile))
    mr = _round_up(m, 128)
    tm = min(tm, mr)
    # Keep >= 2 grid steps when there are enough modes so the "parallel" grid
    # axis has work for both v7x TensorCores (free on single-TC v5e/v6e).
    if mr >= 256:
        tm = min(tm, max(128, (mr // 2) // 128 * 128))
    return tm


def _spectral_mul_kernel(x_ref, w_ref, o_ref):
    """One lane-tile of the spectral contraction (Gauss 3-mult complex form).

    Block shapes (ri packed on the leading axis -> 3 DMA streams):
      x : (2, inC, B,    TM)   f32
      w : (2, inC, outC, TM)   f32 or bf16 (upcast once per channel tile)
      o : (2, B,   outC, TM)   f32
    """
    _, in_c, b, tm = x_ref.shape
    out_c = w_ref.shape[2]

    def chan(c, carry):
        acc_r, acc_i = carry
        x_r = x_ref[0, c]                               # (B, TM)
        x_i = x_ref[1, c]
        w_r = w_ref[0, c].astype(jnp.float32)           # (outC, TM), cast once/tile
        w_i = w_ref[1, c].astype(jnp.float32)
        # Gauss / 3-multiply complex product:
        #   t1 = (xr+xi)*wr ; real = t1 - xi*(wr+wi) ; imag = t1 + xr*(wi-wr)
        # weight-only sums hoisted out of the B broadcast, x-only sum hoisted
        # out of the outC broadcast.
        xs = (x_r + x_i)[:, None, :]                    # (B, 1, TM)
        ws = (w_r + w_i)[None, :, :]                    # (1, outC, TM)
        wd = (w_i - w_r)[None, :, :]
        t1 = xs * w_r[None, :, :]                       # (B, outC, TM)
        acc_r = acc_r + (t1 - x_i[:, None, :] * ws)
        acc_i = acc_i + (t1 + x_r[:, None, :] * wd)
        return acc_r, acc_i

    acc_r = jnp.zeros((b, out_c, tm), jnp.float32)
    acc_i = jnp.zeros((b, out_c, tm), jnp.float32)
    if in_c <= 8:
        # tiny channel counts (demo shapes): static unroll is cheap to trace
        for c in range(in_c):
            acc_r, acc_i = chan(c, (acc_r, acc_i))
    else:
        # production inC (32-64): bounded trace size, partial unroll for LLO
        acc_r, acc_i = lax.fori_loop(0, in_c, chan, (acc_r, acc_i), unroll=8)

    o_ref[0] = acc_r.astype(o_ref.dtype)
    o_ref[1] = acc_i.astype(o_ref.dtype)


def spectral_mul_pallas(x_pk, w_pk, tile_m, vmem_limit):
    _, in_c, b, mp = x_pk.shape
    out_c = w_pk.shape[2]
    assert mp % tile_m == 0 and tile_m % 128 == 0

    return pl.pallas_call(
        _spectral_mul_kernel,
        grid=(mp // tile_m,),
        in_specs=[
            pl.BlockSpec((2, in_c, b, tile_m), lambda m: (0, 0, 0, m)),
            pl.BlockSpec((2, in_c, out_c, tile_m), lambda m: (0, 0, 0, m)),
        ],
        out_specs=pl.BlockSpec((2, b, out_c, tile_m), lambda m: (0, 0, 0, m)),
        out_shape=jax.ShapeDtypeStruct((2, b, out_c, mp), jnp.float32),
        compiler_params=pltpu.CompilerParams(
            # independent mode tiles -> shard across v7x's 2 TensorCores
            dimension_semantics=("parallel",),
            vmem_limit_bytes=vmem_limit,
        ),
    )(x_pk, w_pk)


def spectral_conv2d(x, weights, modes_x, modes_y, *, weight_dtype=jnp.float32):
    """Forward pass of SpectralConv2d. x: (B, inC, H, W) NCHW, weights:
    (inC, outC, modes_x, modes_y, 2) — same semantics as the PyTorch module.
    weight_dtype=jnp.bfloat16 halves the dominant weight HBM stream (f32
    accumulation preserved); default f32 matches the reference numerics."""
    B, inC, H, W = x.shape
    outC = weights.shape[1]

    # TODO(synk): rfft2 / irfft2 have no Pallas TPU equivalent; they run via
    # XLA's FFT op (ortho norm matches torch.fft.rfft2/irfft2(norm='ortho')).
    x_ft = jnp.fft.rfft2(x.astype(jnp.float32), norm="ortho")  # (B, inC, H, W//2+1)
    Wf = x_ft.shape[-1]

    x_limit = min(modes_x, H)
    y_limit = min(modes_y, Wf)
    M = x_limit * y_limit

    vmem_limit = _vmem_limit_bytes()
    w_bytes = jnp.dtype(weight_dtype).itemsize
    tile_m = _pick_tile_m(M, B, inC, outC, w_bytes, (vmem_limit * 3) // 4)
    Mp = _round_up(M, tile_m)
    pad_m = Mp - M

    # Lane-dense packing: ri on the leading axis (3 DMA streams), inC on a
    # leading untiled axis so the in-kernel channel index is pure address math,
    # retained modes flattened and padded to a multiple of the mode tile so
    # every store is an unmasked full-lane write.
    # NOTE: with inC/outC < 8 the sublane dim of each vreg is partly padding;
    # this path is sized for production channel counts (>= 8).
    xs = x_ft[:, :, :x_limit, :y_limit]
    x_pk = jnp.stack([jnp.real(xs), jnp.imag(xs)], axis=0)      # (2,B,inC,xl,yl)
    x_pk = x_pk.transpose(0, 2, 1, 3, 4).reshape(2, inC, B, M)
    x_pk = jnp.pad(x_pk, ((0, 0), (0, 0), (0, 0), (0, pad_m))).astype(jnp.float32)

    ws = weights[:, :, :x_limit, :y_limit, :].astype(jnp.float32)
    w_pk = jnp.moveaxis(ws, -1, 0).reshape(2, inC, outC, M)     # ri leading
    w_pk = jnp.pad(w_pk, ((0, 0), (0, 0), (0, 0), (0, pad_m))).astype(weight_dtype)

    o_pk = spectral_mul_pallas(x_pk, w_pk, tile_m, vmem_limit)  # (2,B,outC,Mp)
    o = o_pk[:, :, :, :M].reshape(2, B, outC, x_limit, y_limit)

    # Zero-fill the rest of the spectrum via pad (no full-size zeros + scatter).
    out_c = (o[0] + 1j * o[1]).astype(jnp.complex64)
    out_ft = jnp.pad(out_c, ((0, 0), (0, 0), (0, H - x_limit), (0, Wf - y_limit)))
    x_out = jnp.fft.irfft2(out_ft, s=(H, W), norm="ortho")
    return x_out


if __name__ == "__main__":
    # Small shapes consistent with the module
    B, inC, outC = 2, 4, 4
    H = W = 16
    modes_x, modes_y = 8, 5

    key = jax.random.PRNGKey(0)
    kx, kw = jax.random.split(key)
    x = jax.random.normal(kx, (B, inC, H, W), dtype=jnp.float32)
    # torch.randn(inC, outC, modes_x, modes_y, 2) * 0.02 (deterministic init here)
    weights = jax.random.normal(kw, (inC, outC, modes_x, modes_y, 2),
                                dtype=jnp.float32) * 0.02

    out = spectral_conv2d(x, weights, modes_x, modes_y)
    out = jax.block_until_ready(out)
    assert out.shape == (B, outC, H, W), out.shape

    # Pure-JAX reference for the whole forward (einsum replaces the Pallas kernel)
    x_ft = jnp.fft.rfft2(x, norm="ortho")
    Wf = x_ft.shape[-1]
    xl, yl = min(modes_x, H), min(modes_y, Wf)
    xs = x_ft[:, :, :xl, :yl]
    w_c = weights[:, :, :xl, :yl, 0] + 1j * weights[:, :, :xl, :yl, 1]
    out_slice = jnp.einsum("bixy,ioxy->boxy", xs, w_c)
    ref_ft = jnp.zeros((B, outC, H, Wf), dtype=jnp.complex64)
    ref_ft = ref_ft.at[:, :, :xl, :yl].set(out_slice)
    ref = jnp.fft.irfft2(ref_ft, s=(H, W), norm="ortho")

    assert jnp.allclose(out, ref, atol=1e-5, rtol=1e-5), float(jnp.max(jnp.abs(out - ref)))
    print("KERNEL_OK")
</pallas_src>

<mosaic_0001>
module attributes {stable_mosaic.version = 11 : i64} {
  func.func @_spectral_mul_kernel(%arg0: i32, %arg1: memref<2x4x2x128xf32, #tpu.memory_space<vmem>>, %arg2: memref<2x4x4x128xf32, #tpu.memory_space<vmem>>, %arg3: memref<2x2x4x128xf32, #tpu.memory_space<vmem>>) attributes {dimension_semantics = [#tpu.dimension_semantics<parallel>], iteration_bounds = array<i64: 1>, scalar_prefetch = 0 : i64, scratch_operands = 0 : i64, tpu.core_type = #tpu.core_type<tc>, window_params = [{transform_indices = @transform_0, window_bounds = array<i64: 2, 4, 2, 128>}, {transform_indices = @transform_1, window_bounds = array<i64: 2, 4, 4, 128>}, {transform_indices = @transform_2, window_bounds = array<i64: 2, 2, 4, 128>}]} {
    %cst = arith.constant 0.000000e+00 : f32
    %0 = vector.broadcast %cst : f32 to vector<2x4x128xf32>
    %cst_0 = arith.constant 0.000000e+00 : f32
    %1 = vector.broadcast %cst_0 : f32 to vector<2x4x128xf32>
    %c0 = arith.constant 0 : index
    %c0_1 = arith.constant 0 : index
    %c0_2 = arith.constant 0 : index
    %c0_3 = arith.constant 0 : index
    %2 = vector.load %arg1[%c0, %c0_1, %c0_2, %c0_3] : memref<2x4x2x128xf32, #tpu.memory_space<vmem>>, vector<1x1x2x128xf32>
    %3 = vector.shape_cast %2 : vector<1x1x2x128xf32> to vector<2x128xf32>
    %c1 = arith.constant 1 : index
    %c0_4 = arith.constant 0 : index
    %c0_5 = arith.constant 0 : index
    %c0_6 = arith.constant 0 : index
    %4 = vector.load %arg1[%c1, %c0_4, %c0_5, %c0_6] : memref<2x4x2x128xf32, #tpu.memory_space<vmem>>, vector<1x1x2x128xf32>
    %5 = vector.shape_cast %4 : vector<1x1x2x128xf32> to vector<2x128xf32>
    %c0_7 = arith.constant 0 : index
    %c0_8 = arith.constant 0 : index
    %c0_9 = arith.constant 0 : index
    %c0_10 = arith.constant 0 : index
    %6 = vector.load %arg2[%c0_7, %c0_8, %c0_9, %c0_10] : memref<2x4x4x128xf32, #tpu.memory_space<vmem>>, vector<1x1x4x128xf32>
    %7 = vector.shape_cast %6 : vector<1x1x4x128xf32> to vector<4x128xf32>
    %c1_11 = arith.constant 1 : index
    %c0_12 = arith.constant 0 : index
    %c0_13 = arith.constant 0 : index
    %c0_14 = arith.constant 0 : index
    %8 = vector.load %arg2[%c1_11, %c0_12, %c0_13, %c0_14] : memref<2x4x4x128xf32, #tpu.memory_space<vmem>>, vector<1x1x4x128xf32>
    %9 = vector.shape_cast %8 : vector<1x1x4x128xf32> to vector<4x128xf32>
    %10 = arith.addf %3, %5 : vector<2x128xf32>
    %11 = vector.shape_cast %10 : vector<2x128xf32> to vector<2x1x128xf32>
    %12 = arith.addf %7, %9 : vector<4x128xf32>
    %13 = vector.shape_cast %12 : vector<4x128xf32> to vector<1x4x128xf32>
    %14 = arith.subf %9, %7 : vector<4x128xf32>
    %15 = vector.shape_cast %14 : vector<4x128xf32> to vector<1x4x128xf32>
    %16 = vector.shape_cast %7 : vector<4x128xf32> to vector<1x4x128xf32>
    %17 = vector.broadcast %11 : vector<2x1x128xf32> to vector<2x4x128xf32>
    %18 = vector.broadcast %16 : vector<1x4x128xf32> to vector<2x4x128xf32>
    %19 = arith.mulf %17, %18 : vector<2x4x128xf32>
    %20 = vector.shape_cast %5 : vector<2x128xf32> to vector<2x1x128xf32>
    %21 = vector.broadcast %20 : vector<2x1x128xf32> to vector<2x4x128xf32>
    %22 = vector.broadcast %13 : vector<1x4x128xf32> to vector<2x4x128xf32>
    %23 = arith.mulf %21, %22 : vector<2x4x128xf32>
    %24 = arith.subf %19, %23 : vector<2x4x128xf32>
    %25 = arith.addf %0, %24 : vector<2x4x128xf32>
    %26 = vector.shape_cast %3 : vector<2x128xf32> to vector<2x1x128xf32>
    %27 = vector.broadcast %26 : vector<2x1x128xf32> to vector<2x4x128xf32>
    %28 = vector.broadcast %15 : vector<1x4x128xf32> to vector<2x4x128xf32>
    %29 = arith.mulf %27, %28 : vector<2x4x128xf32>
    %30 = arith.addf %19, %29 : vector<2x4x128xf32>
    %31 = arith.addf %1, %30 : vector<2x4x128xf32>
    %c0_15 = arith.constant 0 : index
    %c1_16 = arith.constant 1 : index
    %c0_17 = arith.constant 0 : index
    %c0_18 = arith.constant 0 : index
    %32 = vector.load %arg1[%c0_15, %c1_16, %c0_17, %c0_18] : memref<2x4x2x128xf32, #tpu.memory_space<vmem>>, vector<1x1x2x128xf32>
    %33 = vector.shape_cast %32 : vector<1x1x2x128xf32> to vector<2x128xf32>
    %c1_19 = arith.constant 1 : index
    %c1_20 = arith.constant 1 : index
    %c0_21 = arith.constant 0 : index
    %c0_22 = arith.constant 0 : index
    %34 = vector.load %arg1[%c1_19, %c1_20, %c0_21, %c0_22] : memref<2x4x2x128xf32, #tpu.memory_space<vmem>>, vector<1x1x2x128xf32>
    %35 = vector.shape_cast %34 : vector<1x1x2x128xf32> to vector<2x128xf32>
    %c0_23 = arith.constant 0 : index
    %c1_24 = arith.constant 1 : index
    %c0_25 = arith.constant 0 : index
    %c0_26 = arith.constant 0 : index
    %36 = vector.load %arg2[%c0_23, %c1_24, %c0_25, %c0_26] : memref<2x4x4x128xf32, #tpu.memory_space<vmem>>, vector<1x1x4x128xf32>
    %37 = vector.shape_cast %36 : vector<1x1x4x128xf32> to vector<4x128xf32>
    %c1_27 = arith.constant 1 : index
    %c1_28 = arith.constant 1 : index
    %c0_29 = arith.constant 0 : index
    %c0_30 = arith.constant 0 : index
    %38 = vector.load %arg2[%c1_27, %c1_28, %c0_29, %c0_30] : memref<2x4x4x128xf32, #tpu.memory_space<vmem>>, vector<1x1x4x128xf32>
    %39 = vector.shape_cast %38 : vector<1x1x4x128xf32> to vector<4x128xf32>
    %40 = arith.addf %33, %35 : vector<2x128xf32>
    %41 = vector.shape_cast %40 : vector<2x128xf32> to vector<2x1x128xf32>
    %42 = arith.addf %37, %39 : vector<4x128xf32>
    %43 = vector.shape_cast %42 : vector<4x128xf32> to vector<1x4x128xf32>
    %44 = arith.subf %39, %37 : vector<4x128xf32>
    %45 = vector.shape_cast %44 : vector<4x128xf32> to vector<1x4x128xf32>
    %46 = vector.shape_cast %37 : vector<4x128xf32> to vector<1x4x128xf32>
    %47 = vector.broadcast %41 : vector<2x1x128xf32> to vector<2x4x128xf32>
    %48 = vector.broadcast %46 : vector<1x4x128xf32> to vector<2x4x128xf32>
    %49 = arith.mulf %47, %48 : vector<2x4x128xf32>
    %50 = vector.shape_cast %35 : vector<2x128xf32> to vector<2x1x128xf32>
    %51 = vector.broadcast %50 : vector<2x1x128xf32> to vector<2x4x128xf32>
    %52 = vector.broadcast %43 : vector<1x4x128xf32> to vector<2x4x128xf32>
    %53 = arith.mulf %51, %52 : vector<2x4x128xf32>
    %54 = arith.subf %49, %53 : vector<2x4x128xf32>
    %55 = arith.addf %25, %54 : vector<2x4x128xf32>
    %56 = vector.shape_cast %33 : vector<2x128xf32> to vector<2x1x128xf32>
    %57 = vector.broadcast %56 : vector<2x1x128xf32> to vector<2x4x128xf32>
    %58 = vector.broadcast %45 : vector<1x4x128xf32> to vector<2x4x128xf32>
    %59 = arith.mulf %57, %58 : vector<2x4x128xf32>
    %60 = arith.addf %49, %59 : vector<2x4x128xf32>
    %61 = arith.addf %31, %60 : vector<2x4x128xf32>
    %c0_31 = arith.constant 0 : index
    %c2 = arith.constant 2 : index
    %c0_32 = arith.constant 0 : index
    %c0_33 = arith.constant 0 : index
    %62 = vector.load %arg1[%c0_31, %c2, %c0_32, %c0_33] : memref<2x4x2x128xf32, #tpu.memory_space<vmem>>, vector<1x1x2x128xf32>
    %63 = vector.shape_cast %62 : vector<1x1x2x128xf32> to vector<2x128xf32>
    %c1_34 = arith.constant 1 : index
    %c2_35 = arith.constant 2 : index
    %c0_36 = arith.constant 0 : index
    %c0_37 = arith.constant 0 : index
    %64 = vector.load %arg1[%c1_34, %c2_35, %c0_36, %c0_37] : memref<2x4x2x128xf32, #tpu.memory_space<vmem>>, vector<1x1x2x128xf32>
    %65 = vector.shape_cast %64 : vector<1x1x2x128xf32> to vector<2x128xf32>
    %c0_38 = arith.constant 0 : index
    %c2_39 = arith.constant 2 : index
    %c0_40 = arith.constant 0 : index
    %c0_41 = arith.constant 0 : index
    %66 = vector.load %arg2[%c0_38, %c2_39, %c0_40, %c0_41] : memref<2x4x4x128xf32, #tpu.memory_space<vmem>>, vector<1x1x4x128xf32>
    %67 = vector.shape_cast %66 : vector<1x1x4x128xf32> to vector<4x128xf32>
    %c1_42 = arith.constant 1 : index
    %c2_43 = arith.constant 2 : index
    %c0_44 = arith.constant 0 : index
    %c0_45 = arith.constant 0 : index
    %68 = vector.load %arg2[%c1_42, %c2_43, %c0_44, %c0_45] : memref<2x4x4x128xf32, #tpu.memory_space<vmem>>, vector<1x1x4x128xf32>
    %69 = vector.shape_cast %68 : vector<1x1x4x128xf32> to vector<4x128xf32>
    %70 = arith.addf %63, %65 : vector<2x128xf32>
    %71 = vector.shape_cast %70 : vector<2x128xf32> to vector<2x1x128xf32>
    %72 = arith.addf %67, %69 : vector<4x128xf32>
    %73 = vector.shape_cast %72 : vector<4x128xf32> to vector<1x4x128xf32>
    %74 = arith.subf %69, %67 : vector<4x128xf32>
    %75 = vector.shape_cast %74 : vector<4x128xf32> to vector<1x4x128xf32>
    %76 = vector.shape_cast %67 : vector<4x128xf32> to vector<1x4x128xf32>
    %77 = vector.broadcast %71 : vector<2x1x128xf32> to vector<2x4x128xf32>
    %78 = vector.broadcast %76 : vector<1x4x128xf32> to vector<2x4x128xf32>
    %79 = arith.mulf %77, %78 : vector<2x4x128xf32>
    %80 = vector.shape_cast %65 : vector<2x128xf32> to vector<2x1x128xf32>
    %81 = vector.broadcast %80 : vector<2x1x128xf32> to vector<2x4x128xf32>
    %82 = vector.broadcast %73 : vector<1x4x128xf32> to vector<2x4x128xf32>
    %83 = arith.mulf %81, %82 : vector<2x4x128xf32>
    %84 = arith.subf %79, %83 : vector<2x4x128xf32>
    %85 = arith.addf %55, %84 : vector<2x4x128xf32>
    %86 = vector.shape_cast %63 : vector<2x128xf32> to vector<2x1x128xf32>
    %87 = vector.broadcast %86 : vector<2x1x128xf32> to vector<2x4x128xf32>
    %88 = vector.broadcast %75 : vector<1x4x128xf32> to vector<2x4x128xf32>
    %89 = arith.mulf %87, %88 : vector<2x4x128xf32>
    %90 = arith.addf %79, %89 : vector<2x4x128xf32>
    %91 = arith.addf %61, %90 : vector<2x4x128xf32>
    %c0_46 = arith.constant 0 : index
    %c3 = arith.constant 3 : index
    %c0_47 = arith.constant 0 : index
    %c0_48 = arith.constant 0 : index
    %92 = vector.load %arg1[%c0_46, %c3, %c0_47, %c0_48] : memref<2x4x2x128xf32, #tpu.memory_space<vmem>>, vector<1x1x2x128xf32>
    %93 = vector.shape_cast %92 : vector<1x1x2x128xf32> to vector<2x128xf32>
    %c1_49 = arith.constant 1 : index
    %c3_50 = arith.constant 3 : index
    %c0_51 = arith.constant 0 : index
    %c0_52 = arith.constant 0 : index
    %94 = vector.load %arg1[%c1_49, %c3_50, %c0_51, %c0_52] : memref<2x4x2x128xf32, #tpu.memory_space<vmem>>, vector<1x1x2x128xf32>
    %95 = vector.shape_cast %94 : vector<1x1x2x128xf32> to vector<2x128xf32>
    %c0_53 = arith.constant 0 : index
    %c3_54 = arith.constant 3 : index
    %c0_55 = arith.constant 0 : index
    %c0_56 = arith.constant 0 : index
    %96 = vector.load %arg2[%c0_53, %c3_54, %c0_55, %c0_56] : memref<2x4x4x128xf32, #tpu.memory_space<vmem>>, vector<1x1x4x128xf32>
    %97 = vector.shape_cast %96 : vector<1x1x4x128xf32> to vector<4x128xf32>
    %c1_57 = arith.constant 1 : index
    %c3_58 = arith.constant 3 : index
    %c0_59 = arith.constant 0 : index
    %c0_60 = arith.constant 0 : index
    %98 = vector.load %arg2[%c1_57, %c3_58, %c0_59, %c0_60] : memref<2x4x4x128xf32, #tpu.memory_space<vmem>>, vector<1x1x4x128xf32>
    %99 = vector.shape_cast %98 : vector<1x1x4x128xf32> to vector<4x128xf32>
    %100 = arith.addf %93, %95 : vector<2x128xf32>
    %101 = vector.shape_cast %100 : vector<2x128xf32> to vector<2x1x128xf32>
    %102 = arith.addf %97, %99 : vector<4x128xf32>
    %103 = vector.shape_cast %102 : vector<4x128xf32> to vector<1x4x128xf32>
    %104 = arith.subf %99, %97 : vector<4x128xf32>
    %105 = vector.shape_cast %104 : vector<4x128xf32> to vector<1x4x128xf32>
    %106 = vector.shape_cast %97 : vector<4x128xf32> to vector<1x4x128xf32>
    %107 = vector.broadcast %101 : vector<2x1x128xf32> to vector<2x4x128xf32>
    %108 = vector.broadcast %106 : vector<1x4x128xf32> to vector<2x4x128xf32>
    %109 = arith.mulf %107, %108 : vector<2x4x128xf32>
    %110 = vector.shape_cast %95 : vector<2x128xf32> to vector<2x1x128xf32>
    %111 = vector.broadcast %110 : vector<2x1x128xf32> to vector<2x4x128xf32>
    %112 = vector.broadcast %103 : vector<1x4x128xf32> to vector<2x4x128xf32>
    %113 = arith.mulf %111, %112 : vector<2x4x128xf32>
    %114 = arith.subf %109, %113 : vector<2x4x128xf32>
    %115 = arith.addf %85, %114 : vector<2x4x128xf32>
    %116 = vector.shape_cast %93 : vector<2x128xf32> to vector<2x1x128xf32>
    %117 = vector.broadcast %116 : vector<2x1x128xf32> to vector<2x4x128xf32>
    %118 = vector.broadcast %105 : vector<1x4x128xf32> to vector<2x4x128xf32>
    %119 = arith.mulf %117, %118 : vector<2x4x128xf32>
    %120 = arith.addf %109, %119 : vector<2x4x128xf32>
    %121 = arith.addf %91, %120 : vector<2x4x128xf32>
    %c0_61 = arith.constant 0 : index
    %c0_62 = arith.constant 0 : index
    %c0_63 = arith.constant 0 : index
    %c0_64 = arith.constant 0 : index
    %122 = vector.load %arg3[%c0_61, %c0_62, %c0_63, %c0_64] : memref<2x2x4x128xf32, #tpu.memory_space<vmem>>, vector<1x2x4x128xf32>
    %123 = vector.shape_cast %122 : vector<1x2x4x128xf32> to vector<2x4x128xf32>
    %124 = vector.shape_cast %115 : vector<2x4x128xf32> to vector<1x2x4x128xf32>
    tpu.vector_store %arg3[%c0_61, %c0_62, %c0_63, %c0_64], %124 {strides = array<i32>} : memref<2x2x4x128xf32, #tpu.memory_space<vmem>>, vector<1x2x4x128xf32>,
    %c1_65 = arith.constant 1 : index
    %c0_66 = arith.constant 0 : index
    %c0_67 = arith.constant 0 : index
    %c0_68 = arith.constant 0 : index
    %125 = vector.load %arg3[%c1_65, %c0_66, %c0_67, %c0_68] : memref<2x2x4x128xf32, #tpu.memory_space<vmem>>, vector<1x2x4x128xf32>
    %126 = vector.shape_cast %125 : vector<1x2x4x128xf32> to vector<2x4x128xf32>
    %127 = vector.shape_cast %121 : vector<2x4x128xf32> to vector<1x2x4x128xf32>
    tpu.vector_store %arg3[%c1_65, %c0_66, %c0_67, %c0_68], %127 {strides = array<i32>} : memref<2x2x4x128xf32, #tpu.memory_space<vmem>>, vector<1x2x4x128xf32>,
    return
  }
  func.func @transform_0(%arg0: i32) -> (i32, i32, i32, i32) {
    %c0_i32 = arith.constant 0 : i32
    %c0_i32_0 = arith.constant 0 : i32
    %c0_i32_1 = arith.constant 0 : i32
    %c0_i32_2 = arith.constant 0 : i32
    return %c0_i32, %c0_i32_0, %c0_i32_1, %arg0 : i32, i32, i32, i32
  }
  func.func @transform_1(%arg0: i32) -> (i32, i32, i32, i32) {
    %c0_i32 = arith.constant 0 : i32
    %c0_i32_0 = arith.constant 0 : i32
    %c0_i32_1 = arith.constant 0 : i32
    %c0_i32_2 = arith.constant 0 : i32
    return %c0_i32, %c0_i32_0, %c0_i32_1, %arg0 : i32, i32, i32, i32
  }
  func.func @transform_2(%arg0: i32) -> (i32, i32, i32, i32) {
    %c0_i32 = arith.constant 0 : i32
    %c0_i32_0 = arith.constant 0 : i32
    %c0_i32_1 = arith.constant 0 : i32
    %c0_i32_2 = arith.constant 0 : i32
    return %c0_i32, %c0_i32_0, %c0_i32_1, %arg0 : i32, i32, i32, i32
  }
}

</mosaic_0001>

<bundles_post_ra>
// kernel: tpu_custom_call.1
= control target key start
LH: loop header
LB: loop body
LE: loop exit
PB: predicated region body
PF: predicated region fallthrough
CT: control target
= control target key end

     0   :  { %7 = vsyncpa [#allocation3], 0  ;;  %s389_s0 = inlined_call_operand.hbm [shape: f32[2,4,2,128], index: 0, kind: input, shape index: {}]   ;;  %s390_s1 = inlined_call_operand.hbm [shape: f32[2,4,4,128], index: 1, kind: input, shape index: {}]   ;;  %s391_s2 = inlined_call_operand.hbm [shape: f32[2,2,4,128], index: 2, kind: output, shape index: {}]  }
   0x1   :  { %8 = vsyncpa [#allocation6], 0 }
   0x2   :  { %9 = vsyncpa [#allocation4], 0  ;;  %s14_s11 = sshll.u32 %s389_s0, 4  ;;  %s324_s12 = smov [#allocation2]   ;;  %s15_s11 = int_to_ptr.hbm [resolvable:$true] %s14_s11 }
   0x3   :  { %s16_s13 = sshll.u32 %s324_s12, 4  ;;  %s27_s16 = sshll.u32 %s390_s1, 4  ;;  %s17_s13 = int_to_ptr.vmem [resolvable:$true] %s16_s13  ;;  %s28_s16 = int_to_ptr.hbm [resolvable:$true] %s27_s16 }
   0x4   :  { %s325_s17 = smov 32   ;;  %s326_s18 = smov 2  }
   0x5   :  { %22 = dma.hbm_to_vmem [thread:$0]  %s15_s11, 256, %s17_s13, [#allocation3], %s325_s17, %s325_s17, %s326_s18  }
   0x6   :  { %s327_s19 = smov [#allocation5]   ;;  %s328_s21 = smov 64  }
   0x7   :  { %s29_s20 = sshll.u32 %s327_s19, 4  ;;  %s329_s22 = smov 4   ;;  %s30_s20 = int_to_ptr.vmem [resolvable:$true] %s29_s20 }
   0x8   :  { %35 = dma.hbm_to_vmem [thread:$0]  %s28_s16, 512, %s30_s20, [#allocation6], %s328_s21, %s328_s21, %s329_s22  }
   0x9   :  { %318 = dma.done.wait [#allocation3], 256  }
   0xa   :  { %319 = vsyncadd [#allocation3], 4294967040 }
   0xb   :  { %320 = dma.done.wait [#allocation6], 512  }
   0xc   :  { %321 = vsyncadd [#allocation6], 4294966784  ;;  %v355_v0 = vld [vmem:[#allocation2] sm:$0x3]  ;;  %v46_v1 = vld [vmem:[#allocation2 + $0x8] sm:$0x3] }
   0xd   :  { %v47_v2 = vld [vmem:[#allocation5] sm:$0xf]  ;;  %v49_v3 = vld [vmem:[#allocation5 + $0x10] sm:$0xf]  ;;  %v50_v4 = vadd.f32 %v46_v1, %v355_v0  ;;  %v63_v5 = vperm.slane %v46_v1, 0  ;;  %v62_v7 = vrot.slane %v46_v1, 1 }
   0xe   :  { %v358_v6 = vld [vmem:[#allocation2 + $0x2] sm:$0x3]  ;;  %v53_v8 = vadd.f32 %v49_v3, %v47_v2  ;;  %v88_v9 = vld [vmem:[#allocation2 + $0xa] sm:$0x3]  ;;  %v90_v10 = vld [vmem:[#allocation5 + $0x4] sm:$0xf]  ;;  %v360_v12 = vsub.f32 %v49_v3, %v47_v2 }
   0xf   :  { %v92_v11 = vld [vmem:[#allocation5 + $0x14] sm:$0xf]  ;;  %v55_v13 = vperm.slane %v50_v4, 0  ;;  %v93_v14 = vadd.f32 %v88_v9, %v358_v6  ;;  %v106_v16 = vperm.slane %v88_v9, 0  ;;  %v131_v18 = vld [vmem:[#allocation2 + $0xc] sm:$0x3] }
  0x10   :  { %v96_v15 = vadd.f32 %v92_v11, %v90_v10  ;;  %v363_v17 = vld [vmem:[#allocation2 + $0x4] sm:$0x3]  ;;  %v67_v19 = vmul.f32 %v63_v5, %v53_v8  ;;  %v133_v20 = vld [vmem:[#allocation5 + $0x8] sm:$0xf]  ;;  %v135_v21 = vld [vmem:[#allocation5 + $0x18] sm:$0xf]  ;;  %v369_v36 = vsub.f32 %v92_v11, %v90_v10 }
  0x11   :  { %v136_v22 = vadd.f32 %v131_v18, %v363_v17  ;;  %v149_v23 = vperm.slane %v131_v18, 0  ;;  %v52_v24 = vrot.slane %v50_v4, 1  ;;  %v59_v25 = vmul.f32 %v55_v13, %v47_v2  ;;  %v366_v29 = vld [vmem:[#allocation2 + $0x6] sm:$0x3]  ;;  %v174_v30 = vld [vmem:[#allocation2 + $0xe] sm:$0x3] }
  0x12   :  { %v98_v26 = vperm.slane %v93_v14, 0  ;;  %v110_v27 = vmul.f32 %v106_v16, %v96_v15  ;;  %v139_v28 = vadd.f32 %v135_v21, %v133_v20  ;;  %v176_v32 = vld [vmem:[#allocation5 + $0xc] sm:$0xf]  ;;  %v178_v33 = vld [vmem:[#allocation5 + $0x1c] sm:$0xf]  ;;  %v179_v34 = vadd.f32 %v174_v30, %v366_v29  ;;  %s330_s0 = smov [#allocation7]  }
  0x13   :  { %v141_v31 = vperm.slane %v136_v22, 0  ;;  %v192_v35 = vperm.slane %v174_v30, 0  ;;  %v69_v37 = vsub.f32 %v59_v25, %v67_v19  ;;  %v182_v40 = vadd.f32 %v178_v33, %v176_v32  ;;  %s223_s1 = sshll.u32 %s330_s0, 4  ;;  %s225_s25 = sshll.u32 %s391_s2, 4  ;;  %s224_s1 = int_to_ptr.vmem [resolvable:$true] %s223_s1  ;;  %s226_s25 = int_to_ptr.hbm [resolvable:$true] %s225_s25 }
  0x14   :  { %v102_v38 = vmul.f32 %v98_v26, %v90_v10  ;;  %v153_v39 = vmul.f32 %v149_v23, %v139_v28  ;;  %v184_v42 = vperm.slane %v179_v34, 0  ;;  %v56_v43 = vperm.slane %v52_v24, 0 }
  0x15   :  { %v145_v41 = vmul.f32 %v141_v31, %v133_v20  ;;  %v64_v44 = vperm.slane %v62_v7, 0  ;;  %v196_v46 = vmul.f32 %v192_v35, %v182_v40  ;;  %v95_v47 = vrot.slane %v93_v14, 1 }
  0x16   :  { %v112_v45 = vsub.f32 %v102_v38, %v110_v27  ;;  %v105_v48 = vrot.slane %v88_v9, 1  ;;  %v188_v50 = vmul.f32 %v184_v42, %v176_v32  ;;  %v60_v51 = vmul.f32 %v56_v43, %v47_v2 }
  0x17   :  { %v155_v49 = vsub.f32 %v145_v41, %v153_v39  ;;  %v68_v52 = vmul.f32 %v64_v44, %v53_v8  ;;  %v99_v54 = vperm.slane %v95_v47, 0  ;;  %v138_v56 = vrot.slane %v136_v22, 1 }
  0x18   :  { %v114_v53 = vadd.f32 %v112_v45, %v69_v37  ;;  %v107_v55 = vperm.slane %v105_v48, 0  ;;  %v198_v57 = vsub.f32 %v188_v50, %v196_v46  ;;  %v148_v59 = vrot.slane %v131_v18, 1 }
  0x19   :  { %v70_v58 = vsub.f32 %v60_v51, %v68_v52  ;;  %v181_v60 = vrot.slane %v179_v34, 1  ;;  %v103_v62 = vmul.f32 %v99_v54, %v90_v10  ;;  %v142_v1 = vperm.slane %v138_v56, 0 }
  0x1a   :  { %v157_v61 = vadd.f32 %v155_v49, %v114_v53  ;;  %v111_v63 = vmul.f32 %v107_v55, %v96_v15  ;;  %v150_v3 = vperm.slane %v148_v59, 0  ;;  %v191_v5 = vrot.slane %v174_v30, 1 }
  0x1b   :  { %v185_v4 = vperm.slane %v181_v60, 0  ;;  %v75_v7 = vperm.slane %v355_v0, 0  ;;  %v146_v8 = vmul.f32 %v142_v1, %v133_v20  ;;  %v118_v11 = vperm.slane %v358_v6, 0 }
  0x1c   :  { %v200_v9 = vadd.f32 %v198_v57, %v157_v61  ;;  %v113_v2 = vsub.f32 %v103_v62, %v111_v63  ;;  %v154_v13 = vmul.f32 %v150_v3, %v139_v28  ;;  %v193_v16 = vperm.slane %v191_v5, 0 }
  0x1d   :  { %v189_v14 = vmul.f32 %v185_v4, %v176_v32  ;;  %v79_v18 = vmul.f32 %v75_v7, %v360_v12  ;;  %v122_v10 = vmul.f32 %v118_v11, %v369_v36  ;;  %v140_v15 = vsub.f32 %v135_v21, %v133_v20 }
  0x1e   :  { %214 = vst [vmem:[#allocation7] sm:$0xf] %v200_v9  ;;  %v115_v19 = vadd.f32 %v113_v2, %v70_v58  ;;  %v161_v22 = vperm.slane %v363_v17, 0  ;;  %v156_v23 = vsub.f32 %v146_v8, %v154_v13  ;;  %v197_v24 = vmul.f32 %v193_v16, %v182_v40 }
  0x1f   :  { %v81_v26 = vadd.f32 %v79_v18, %v59_v25  ;;  %v183_v27 = vsub.f32 %v178_v33, %v176_v32  ;;  %v124_v30 = vadd.f32 %v122_v10, %v102_v38  ;;  %v204_v34 = vperm.slane %v366_v29, 0 }
  0x20   :  { %v165_v31 = vmul.f32 %v161_v22, %v140_v15  ;;  %v74_v28 = vrot.slane %v355_v0, 1  ;;  %v158_v35 = vadd.f32 %v156_v23, %v115_v19  ;;  %v199_v37 = vsub.f32 %v189_v14, %v197_v24 }
  0x21   :  { %v117_v39 = vrot.slane %v358_v6, 1  ;;  %v160_v42 = vrot.slane %v363_v17, 1  ;;  %v126_v43 = vadd.f32 %v124_v30, %v81_v26  ;;  %v208_v21 = vmul.f32 %v204_v34, %v183_v27 }
  0x22   :  { %v167_v20 = vadd.f32 %v165_v31, %v145_v41  ;;  %v76_v44 = vperm.slane %v74_v28, 0  ;;  %v201_v45 = vadd.f32 %v199_v37, %v158_v35  ;;  %v203_v32 = vrot.slane %v366_v29, 1 }
  0x23   :  { %v119_v40 = vperm.slane %v117_v39, 0  ;;  %v162_v25 = vperm.slane %v160_v42, 0  ;;  %v210_v38 = vadd.f32 %v208_v21, %v188_v50 }
  0x24   :  { %v169_v33 = vadd.f32 %v167_v20, %v126_v43  ;;  %v80_v46 = vmul.f32 %v76_v44, %v360_v12  ;;  %215 = vst [vmem:[#allocation7 + $0x4] sm:$0xf] %v201_v45  ;;  %v205_v6 = vperm.slane %v203_v32, 0 }
  0x25   :  { %v123_v0 = vmul.f32 %v119_v40, %v369_v36  ;;  %v166_v47 = vmul.f32 %v162_v25, %v140_v15 }
  0x26   :  { %v212_v48 = vadd.f32 %v210_v38, %v169_v33  ;;  %v82_v17 = vadd.f32 %v80_v46, %v60_v51  ;;  %v209_v52 = vmul.f32 %v205_v6, %v183_v27 }
  0x27   :  { %v125_v49 = vadd.f32 %v123_v0, %v103_v62  ;;  %v168_v41 = vadd.f32 %v166_v47, %v146_v8 }
  0x28   :  { %217 = vst [vmem:[#allocation7 + $0x8] sm:$0xf] %v212_v48  ;;  %v211_v54 = vadd.f32 %v209_v52, %v189_v14 }
  0x29   :  { %v127_v53 = vadd.f32 %v125_v49, %v82_v17 }
  0x2b   :  { %v170_v12 = vadd.f32 %v168_v41, %v127_v53 }
  0x2d   :  { %v213_v29 = vadd.f32 %v211_v54, %v170_v12 }
  0x2f   :  { %218 = vst [vmem:[#allocation7 + $0xc] sm:$0xf] %v213_v29 }
  0x30   :  { %231 = dma.vmem_to_hbm [thread:$0]  %s224_s1, 256, %s226_s25, [#allocation4], %s328_s21, %s328_s21, %s329_s22  }
  0x31   :  { %322 = dma.done.wait [#allocation4], 256  }
  0x32   :  { %323 = vsyncadd [#allocation4], 4294967040 }
  0x33   :  { %236 = vsyncpa [#allocation3], 1 }
  0x34   :  { %237 = vsyncpa [#allocation6], 1 }
  0x35   :  { %238 = vsyncpa [#allocation4], 1 }

</bundles_post_ra>
